<compile_context>
chip_gen: v7x
topology: tpu7x:2x2x1
jax: 0.10.0
libtpu: 0.0.40
codegen_flags: <defaults>
</compile_context>

<pallas_src>
import jax
import jax.numpy as jnp
from jax import lax
from jax.experimental import pallas as pl
from jax.experimental.pallas import tpu as pltpu


def _cond_action_ae_kernel(
    x_ref, h_ref,
    wt_ref, bt_ref, g_ref, bln_ref,
    w1x_ref, w1h_ref, b1_ref,
    w2_ref, b2_ref,
    we_ref, be_ref,
    w3z_ref, w3h_ref, b3_ref,
    w4_ref, b4_ref,
    wd_ref, bd_ref,
    out_ref,
):
    f32 = jnp.float32
    bf16 = jnp.bfloat16

    x = x_ref[...].astype(bf16)
    h = h_ref[...].astype(bf16)

    # --- trunk: Linear -> LayerNorm -> Tanh (stats/tanh in f32) ---
    t = jnp.dot(h, wt_ref[...], preferred_element_type=f32) + bt_ref[...]
    mu = jnp.mean(t, axis=-1, keepdims=True)
    var = jnp.mean(jnp.square(t - mu), axis=-1, keepdims=True)
    t = (t - mu) * lax.rsqrt(var + 1e-5)
    t = jnp.tanh(t * g_ref[...] + bln_ref[...])
    t_bf = t.astype(bf16)

    # --- encode: fc1(cat[x, t]) -> relu -> fc2 -> relu -> enc ---
    z = jnp.dot(x, w1x_ref[...], preferred_element_type=f32)
    z = z + jnp.dot(t_bf, w1h_ref[...], preferred_element_type=f32) + b1_ref[...]
    z = jnp.maximum(z, 0.0).astype(bf16)
    z = jnp.maximum(
        jnp.dot(z, w2_ref[...], preferred_element_type=f32) + b2_ref[...], 0.0
    ).astype(bf16)
    z = jnp.dot(z, we_ref[...], preferred_element_type=f32) + be_ref[...]

    # --- decode: fc3(cat[z, t]) -> relu -> fc4 -> relu -> dec ---
    d = jnp.dot(z.astype(bf16), w3z_ref[...], preferred_element_type=f32)
    d = d + jnp.dot(t_bf, w3h_ref[...], preferred_element_type=f32) + b3_ref[...]
    d = jnp.maximum(d, 0.0).astype(bf16)
    d = jnp.maximum(
        jnp.dot(d, w4_ref[...], preferred_element_type=f32) + b4_ref[...], 0.0
    ).astype(bf16)
    out = jnp.dot(d, wd_ref[...], preferred_element_type=f32) + bd_ref[...]

    out_ref[...] = out.astype(out_ref.dtype)


def _round_up(a, m):
    return ((a + m - 1) // m) * m


def conditional_action_ae_forward(x, h, params, *, batch_tile=2048):
    """Pallas implementation of ConditionalActionAE.forward(x, h)."""
    B, action_dim = x.shape
    Bh, ob_rep_dim = h.shape
    assert B == Bh, "x and h must share the batch dimension"

    # --- batch tile selection ---
    # Small batches: one tile (rounded to sublane multiple). Larger batches:
    # at least 2 grid steps (v7x megacore) and tiles that are multiples of 256
    # (MXU M alignment), capped at `batch_tile`.
    if B <= 256:
        tb = _round_up(B, 8)
    else:
        ntiles = max(2, pl.cdiv(B, batch_tile))
        tb = _round_up(pl.cdiv(B, ntiles), 256)
    B_pad = _round_up(B, tb)
    grid = (B_pad // tb,)

    if B_pad != B:  # zero-pad: no ragged/masked tail tile
        x = jnp.pad(x, ((0, B_pad - B), (0, 0)))
        h = jnp.pad(h, ((0, B_pad - B), (0, 0)))

    # --- lane-dense output: pad dec columns to a multiple of 128 lanes ---
    n_out = _round_up(action_dim, 128)
    wd, bd = params["wd"], params["bd"]
    if n_out != action_dim:
        wd = jnp.pad(wd, ((0, 0), (0, n_out - action_dim)))
        bd = jnp.pad(bd, ((0, 0), (0, n_out - action_dim)))

    bf16 = jnp.bfloat16
    f32 = jnp.float32
    p = params
    # Matmul weights in bf16 (native MXU rate, half the VMEM/HBM traffic);
    # biases and LayerNorm affine parameters stay f32.
    ops = (
        p["wt"].astype(bf16), p["bt"].astype(f32),
        p["gamma"].astype(f32), p["beta"].astype(f32),
        p["w1x"].astype(bf16), p["w1h"].astype(bf16), p["b1"].astype(f32),
        p["w2"].astype(bf16), p["b2"].astype(f32),
        p["we"].astype(bf16), p["be"].astype(f32),
        p["w3z"].astype(bf16), p["w3h"].astype(bf16), p["b3"].astype(f32),
        p["w4"].astype(bf16), p["b4"].astype(f32),
        wd.astype(bf16), bd.astype(f32),
    )

    def row_spec(d):
        return pl.BlockSpec((tb, d), lambda i: (i, 0))

    def full_spec(arr):
        return pl.BlockSpec(arr.shape, lambda i: (0, 0))

    in_specs = [row_spec(action_dim), row_spec(ob_rep_dim)]
    in_specs += [full_spec(w) for w in ops]

    # Explicit VMEM budget: double-buffered activation tiles + resident
    # weights + headroom for in-kernel intermediates (safe on v7x's 64 MiB).
    act_bytes = tb * (action_dim + ob_rep_dim + n_out) * 4
    w_bytes = sum(int(w.size) * w.dtype.itemsize for w in ops)
    vmem_limit = int(
        min(48 << 20, max(16 << 20, 4 * act_bytes + 2 * w_bytes + (8 << 20)))
    )

    out_pad = pl.pallas_call(
        _cond_action_ae_kernel,
        out_shape=jax.ShapeDtypeStruct((B_pad, n_out), x.dtype),
        grid=grid,
        in_specs=in_specs,
        out_specs=row_spec(n_out),
        compiler_params=pltpu.CompilerParams(
            dimension_semantics=("parallel",),
            vmem_limit_bytes=vmem_limit,
        ),
    )(x, h, *ops)

    return out_pad[:B, :action_dim]


def _make_params(key, ob_rep_dim, feature_dim, action_dim, act_rep_dim, hidden_dim):
    ks = jax.random.split(key, 16)
    f32 = jnp.float32

    def w(k, fan_in, fan_out):
        return (jax.random.normal(k, (fan_in, fan_out), f32)
                / jnp.sqrt(jnp.asarray(fan_in, f32)))

    def b(k, dim):
        return 0.05 * jax.random.normal(k, (1, dim), f32)

    return {
        # trunk
        "wt": w(ks[0], ob_rep_dim, feature_dim), "bt": b(ks[1], feature_dim),
        "gamma": jnp.ones((1, feature_dim), f32),
        "beta": jnp.zeros((1, feature_dim), f32),
        # fc1 split into action / feature halves (== Linear on cat([x, t]))
        "w1x": w(ks[2], action_dim, hidden_dim),
        "w1h": w(ks[3], feature_dim, hidden_dim), "b1": b(ks[4], hidden_dim),
        "w2": w(ks[5], hidden_dim, hidden_dim), "b2": b(ks[6], hidden_dim),
        "we": w(ks[7], hidden_dim, act_rep_dim), "be": b(ks[8], act_rep_dim),
        # fc3 split into latent / feature halves (== Linear on cat([z, t]))
        "w3z": w(ks[9], act_rep_dim, hidden_dim),
        "w3h": w(ks[10], feature_dim, hidden_dim), "b3": b(ks[11], hidden_dim),
        "w4": w(ks[12], hidden_dim, hidden_dim), "b4": b(ks[13], hidden_dim),
        "wd": w(ks[14], hidden_dim, action_dim), "bd": b(ks[15], action_dim),
    }


def _ref_forward(x, h, p):
    """Pure-JAX f32 reference matching the PyTorch forward."""
    t = h @ p["wt"] + p["bt"]
    mu = t.mean(-1, keepdims=True)
    var = ((t - mu) ** 2).mean(-1, keepdims=True)
    t = (t - mu) / jnp.sqrt(var + 1e-5)
    t = jnp.tanh(t * p["gamma"] + p["beta"])
    z = jax.nn.relu(x @ p["w1x"] + t @ p["w1h"] + p["b1"])
    z = jax.nn.relu(z @ p["w2"] + p["b2"])
    z = z @ p["we"] + p["be"]
    d = jax.nn.relu(z @ p["w3z"] + t @ p["w3h"] + p["b3"])
    d = jax.nn.relu(d @ p["w4"] + p["b4"])
    return d @ p["wd"] + p["bd"]


if __name__ == "__main__":
    key = jax.random.PRNGKey(0)
    k_x, k_h, k_p, k_x2, k_h2 = jax.random.split(key, 5)

    ob_rep_dim, feature_dim = 32, 32
    action_dim, act_rep_dim, hidden_dim = 8, 16, 32
    params = _make_params(k_p, ob_rep_dim, feature_dim, action_dim,
                          act_rep_dim, hidden_dim)

    # Tolerance: kernel uses bf16 MXU operands with f32 accumulators; the
    # reference is pure f32, so allow a few percent of drift.
    rtol = atol = 5e-2

    # Case 1: tiny batch -> single grid step.
    batch = 4
    x = jax.random.normal(k_x, (batch, action_dim), jnp.float32)
    h = jax.random.normal(k_h, (batch, ob_rep_dim), jnp.float32)
    out = jax.block_until_ready(conditional_action_ae_forward(x, h, params))
    ref = _ref_forward(x, h, params)
    assert out.shape == (batch, action_dim)
    assert out.dtype == x.dtype
    assert bool(jnp.allclose(out, ref, rtol=rtol, atol=atol)), \
        "ConditionalActionAE forward mismatch vs reference (small batch)"

    # Case 2: batch not a multiple of the tile -> exercises zero-padding and
    # the >=2-step parallel grid (v7x megacore path).
    batch2 = 600
    x2 = jax.random.normal(k_x2, (batch2, action_dim), jnp.float32)
    h2 = jax.random.normal(k_h2, (batch2, ob_rep_dim), jnp.float32)
    out2 = jax.block_until_ready(conditional_action_ae_forward(x2, h2, params))
    ref2 = _ref_forward(x2, h2, params)
    assert out2.shape == (batch2, action_dim)
    assert bool(jnp.allclose(out2, ref2, rtol=rtol, atol=atol)), \
        "ConditionalActionAE forward mismatch vs reference (padded batch)"

    print("KERNEL_OK")
</pallas_src>

<mosaic_0001>
module attributes {stable_mosaic.version = 11 : i64} {
  func.func @_cond_action_ae_kernel(%arg0: i32, %arg1: memref<8x8xf32, #tpu.memory_space<vmem>>, %arg2: memref<8x32xf32, #tpu.memory_space<vmem>>, %arg3: memref<32x32xbf16, #tpu.memory_space<vmem>>, %arg4: memref<1x32xf32, #tpu.memory_space<vmem>>, %arg5: memref<1x32xf32, #tpu.memory_space<vmem>>, %arg6: memref<1x32xf32, #tpu.memory_space<vmem>>, %arg7: memref<8x32xbf16, #tpu.memory_space<vmem>>, %arg8: memref<32x32xbf16, #tpu.memory_space<vmem>>, %arg9: memref<1x32xf32, #tpu.memory_space<vmem>>, %arg10: memref<32x32xbf16, #tpu.memory_space<vmem>>, %arg11: memref<1x32xf32, #tpu.memory_space<vmem>>, %arg12: memref<32x16xbf16, #tpu.memory_space<vmem>>, %arg13: memref<1x16xf32, #tpu.memory_space<vmem>>, %arg14: memref<16x32xbf16, #tpu.memory_space<vmem>>, %arg15: memref<32x32xbf16, #tpu.memory_space<vmem>>, %arg16: memref<1x32xf32, #tpu.memory_space<vmem>>, %arg17: memref<32x32xbf16, #tpu.memory_space<vmem>>, %arg18: memref<1x32xf32, #tpu.memory_space<vmem>>, %arg19: memref<32x128xbf16, #tpu.memory_space<vmem>>, %arg20: memref<1x128xf32, #tpu.memory_space<vmem>>, %arg21: memref<8x128xf32, #tpu.memory_space<vmem>>) attributes {dimension_semantics = [#tpu.dimension_semantics<parallel>], iteration_bounds = array<i64: 1>, scalar_prefetch = 0 : i64, scratch_operands = 0 : i64, tpu.core_type = #tpu.core_type<tc>, window_params = [{transform_indices = @transform_0, window_bounds = array<i64: 8, 8>}, {transform_indices = @transform_1, window_bounds = array<i64: 8, 32>}, {pipeline_mode = #tpu.pipeline_mode<synchronous>, transform_indices = @transform_2, window_bounds = array<i64: 32, 32>}, {pipeline_mode = #tpu.pipeline_mode<synchronous>, transform_indices = @transform_3, window_bounds = array<i64: 1, 32>}, {pipeline_mode = #tpu.pipeline_mode<synchronous>, transform_indices = @transform_4, window_bounds = array<i64: 1, 32>}, {pipeline_mode = #tpu.pipeline_mode<synchronous>, transform_indices = @transform_5, window_bounds = array<i64: 1, 32>}, {pipeline_mode = #tpu.pipeline_mode<synchronous>, transform_indices = @transform_6, window_bounds = array<i64: 8, 32>}, {pipeline_mode = #tpu.pipeline_mode<synchronous>, transform_indices = @transform_7, window_bounds = array<i64: 32, 32>}, {pipeline_mode = #tpu.pipeline_mode<synchronous>, transform_indices = @transform_8, window_bounds = array<i64: 1, 32>}, {pipeline_mode = #tpu.pipeline_mode<synchronous>, transform_indices = @transform_9, window_bounds = array<i64: 32, 32>}, {pipeline_mode = #tpu.pipeline_mode<synchronous>, transform_indices = @transform_10, window_bounds = array<i64: 1, 32>}, {pipeline_mode = #tpu.pipeline_mode<synchronous>, transform_indices = @transform_11, window_bounds = array<i64: 32, 16>}, {pipeline_mode = #tpu.pipeline_mode<synchronous>, transform_indices = @transform_12, window_bounds = array<i64: 1, 16>}, {pipeline_mode = #tpu.pipeline_mode<synchronous>, transform_indices = @transform_13, window_bounds = array<i64: 16, 32>}, {pipeline_mode = #tpu.pipeline_mode<synchronous>, transform_indices = @transform_14, window_bounds = array<i64: 32, 32>}, {pipeline_mode = #tpu.pipeline_mode<synchronous>, transform_indices = @transform_15, window_bounds = array<i64: 1, 32>}, {pipeline_mode = #tpu.pipeline_mode<synchronous>, transform_indices = @transform_16, window_bounds = array<i64: 32, 32>}, {pipeline_mode = #tpu.pipeline_mode<synchronous>, transform_indices = @transform_17, window_bounds = array<i64: 1, 32>}, {pipeline_mode = #tpu.pipeline_mode<synchronous>, transform_indices = @transform_18, window_bounds = array<i64: 32, 128>}, {pipeline_mode = #tpu.pipeline_mode<synchronous>, transform_indices = @transform_19, window_bounds = array<i64: 1, 128>}, {transform_indices = @transform_20, window_bounds = array<i64: 8, 128>}]} {
    %c0 = arith.constant 0 : index
    %c0_0 = arith.constant 0 : index
    %0 = vector.load %arg1[%c0, %c0_0] : memref<8x8xf32, #tpu.memory_space<vmem>>, vector<8x8xf32>
    %1 = arith.truncf %0 : vector<8x8xf32> to vector<8x8xbf16>
    %c0_1 = arith.constant 0 : index
    %c0_2 = arith.constant 0 : index
    %2 = vector.load %arg2[%c0_1, %c0_2] : memref<8x32xf32, #tpu.memory_space<vmem>>, vector<8x32xf32>
    %3 = arith.truncf %2 : vector<8x32xf32> to vector<8x32xbf16>
    %c0_3 = arith.constant 0 : index
    %c0_4 = arith.constant 0 : index
    %4 = vector.load %arg3[%c0_3, %c0_4] : memref<32x32xbf16, #tpu.memory_space<vmem>>, vector<32x32xbf16>
    %cst = arith.constant dense<0.000000e+00> : vector<8x32xf32>
    %5 = tpu.matmul %3, %4, %cst {dimension_numbers = #tpu.dot_dimension_numbers<[1], [0], [0], [1], [0, 0, 1, 1], [], []>} : vector<8x32xbf16>, vector<32x32xbf16>, vector<8x32xf32> -> vector<8x32xf32>
    %c0_5 = arith.constant 0 : index
    %c0_6 = arith.constant 0 : index
    %6 = vector.load %arg4[%c0_5, %c0_6] : memref<1x32xf32, #tpu.memory_space<vmem>>, vector<1x32xf32>
    %7 = vector.broadcast %6 : vector<1x32xf32> to vector<8x32xf32>
    %8 = arith.addf %5, %7 : vector<8x32xf32>
    %cst_7 = arith.constant dense<0.000000e+00> : vector<8xf32>
    %9 = vector.multi_reduction <add>, %8, %cst_7 [1] : vector<8x32xf32> to vector<8xf32>
    %10 = vector.shape_cast %9 : vector<8xf32> to vector<8x1xf32>
    %cst_8 = arith.constant 3.200000e+01 : f32
    %11 = vector.broadcast %cst_8 : f32 to vector<8x1xf32>
    %12 = arith.divf %10, %11 : vector<8x1xf32>
    %13 = vector.broadcast %12 : vector<8x1xf32> to vector<8x32xf32>
    %14 = arith.subf %8, %13 : vector<8x32xf32>
    %15 = arith.mulf %14, %14 : vector<8x32xf32>
    %cst_9 = arith.constant dense<0.000000e+00> : vector<8xf32>
    %16 = vector.multi_reduction <add>, %15, %cst_9 [1] : vector<8x32xf32> to vector<8xf32>
    %17 = vector.shape_cast %16 : vector<8xf32> to vector<8x1xf32>
    %cst_10 = arith.constant 3.200000e+01 : f32
    %18 = vector.broadcast %cst_10 : f32 to vector<8x1xf32>
    %19 = arith.divf %17, %18 : vector<8x1xf32>
    %20 = vector.broadcast %12 : vector<8x1xf32> to vector<8x32xf32>
    %21 = arith.subf %8, %20 : vector<8x32xf32>
    %cst_11 = arith.constant 9.99999974E-6 : f32
    %22 = vector.broadcast %cst_11 : f32 to vector<8x1xf32>
    %23 = arith.addf %19, %22 : vector<8x1xf32>
    %24 = math.rsqrt %23 : vector<8x1xf32>
    %25 = vector.broadcast %24 : vector<8x1xf32> to vector<8x32xf32>
    %26 = arith.mulf %21, %25 : vector<8x32xf32>
    %c0_12 = arith.constant 0 : index
    %c0_13 = arith.constant 0 : index
    %27 = vector.load %arg5[%c0_12, %c0_13] : memref<1x32xf32, #tpu.memory_space<vmem>>, vector<1x32xf32>
    %28 = vector.broadcast %27 : vector<1x32xf32> to vector<8x32xf32>
    %29 = arith.mulf %26, %28 : vector<8x32xf32>
    %c0_14 = arith.constant 0 : index
    %c0_15 = arith.constant 0 : index
    %30 = vector.load %arg6[%c0_14, %c0_15] : memref<1x32xf32, #tpu.memory_space<vmem>>, vector<1x32xf32>
    %31 = vector.broadcast %30 : vector<1x32xf32> to vector<8x32xf32>
    %32 = arith.addf %29, %31 : vector<8x32xf32>
    %33 = math.tanh %32 : vector<8x32xf32>
    %34 = arith.truncf %33 : vector<8x32xf32> to vector<8x32xbf16>
    %c0_16 = arith.constant 0 : index
    %c0_17 = arith.constant 0 : index
    %35 = vector.load %arg7[%c0_16, %c0_17] : memref<8x32xbf16, #tpu.memory_space<vmem>>, vector<8x32xbf16>
    %cst_18 = arith.constant dense<0.000000e+00> : vector<8x32xf32>
    %36 = tpu.matmul %1, %35, %cst_18 {dimension_numbers = #tpu.dot_dimension_numbers<[1], [0], [0], [1], [0, 0, 1, 1], [], []>} : vector<8x8xbf16>, vector<8x32xbf16>, vector<8x32xf32> -> vector<8x32xf32>
    %c0_19 = arith.constant 0 : index
    %c0_20 = arith.constant 0 : index
    %37 = vector.load %arg8[%c0_19, %c0_20] : memref<32x32xbf16, #tpu.memory_space<vmem>>, vector<32x32xbf16>
    %cst_21 = arith.constant dense<0.000000e+00> : vector<8x32xf32>
    %38 = tpu.matmul %34, %37, %cst_21 {dimension_numbers = #tpu.dot_dimension_numbers<[1], [0], [0], [1], [0, 0, 1, 1], [], []>} : vector<8x32xbf16>, vector<32x32xbf16>, vector<8x32xf32> -> vector<8x32xf32>
    %39 = arith.addf %36, %38 : vector<8x32xf32>
    %c0_22 = arith.constant 0 : index
    %c0_23 = arith.constant 0 : index
    %40 = vector.load %arg9[%c0_22, %c0_23] : memref<1x32xf32, #tpu.memory_space<vmem>>, vector<1x32xf32>
    %41 = vector.broadcast %40 : vector<1x32xf32> to vector<8x32xf32>
    %42 = arith.addf %39, %41 : vector<8x32xf32>
    %cst_24 = arith.constant 0.000000e+00 : f32
    %43 = vector.broadcast %cst_24 : f32 to vector<8x32xf32>
    %44 = arith.maximumf %42, %43 : vector<8x32xf32>
    %45 = arith.truncf %44 : vector<8x32xf32> to vector<8x32xbf16>
    %c0_25 = arith.constant 0 : index
    %c0_26 = arith.constant 0 : index
    %46 = vector.load %arg10[%c0_25, %c0_26] : memref<32x32xbf16, #tpu.memory_space<vmem>>, vector<32x32xbf16>
    %cst_27 = arith.constant dense<0.000000e+00> : vector<8x32xf32>
    %47 = tpu.matmul %45, %46, %cst_27 {dimension_numbers = #tpu.dot_dimension_numbers<[1], [0], [0], [1], [0, 0, 1, 1], [], []>} : vector<8x32xbf16>, vector<32x32xbf16>, vector<8x32xf32> -> vector<8x32xf32>
    %c0_28 = arith.constant 0 : index
    %c0_29 = arith.constant 0 : index
    %48 = vector.load %arg11[%c0_28, %c0_29] : memref<1x32xf32, #tpu.memory_space<vmem>>, vector<1x32xf32>
    %49 = vector.broadcast %48 : vector<1x32xf32> to vector<8x32xf32>
    %50 = arith.addf %47, %49 : vector<8x32xf32>
    %cst_30 = arith.constant 0.000000e+00 : f32
    %51 = vector.broadcast %cst_30 : f32 to vector<8x32xf32>
    %52 = arith.maximumf %50, %51 : vector<8x32xf32>
    %53 = arith.truncf %52 : vector<8x32xf32> to vector<8x32xbf16>
    %c0_31 = arith.constant 0 : index
    %c0_32 = arith.constant 0 : index
    %54 = vector.load %arg12[%c0_31, %c0_32] : memref<32x16xbf16, #tpu.memory_space<vmem>>, vector<32x16xbf16>
    %cst_33 = arith.constant dense<0.000000e+00> : vector<8x16xf32>
    %55 = tpu.matmul %53, %54, %cst_33 {dimension_numbers = #tpu.dot_dimension_numbers<[1], [0], [0], [1], [0, 0, 1, 1], [], []>} : vector<8x32xbf16>, vector<32x16xbf16>, vector<8x16xf32> -> vector<8x16xf32>
    %c0_34 = arith.constant 0 : index
    %c0_35 = arith.constant 0 : index
    %56 = vector.load %arg13[%c0_34, %c0_35] : memref<1x16xf32, #tpu.memory_space<vmem>>, vector<1x16xf32>
    %57 = vector.broadcast %56 : vector<1x16xf32> to vector<8x16xf32>
    %58 = arith.addf %55, %57 : vector<8x16xf32>
    %59 = arith.truncf %58 : vector<8x16xf32> to vector<8x16xbf16>
    %c0_36 = arith.constant 0 : index
    %c0_37 = arith.constant 0 : index
    %60 = vector.load %arg14[%c0_36, %c0_37] : memref<16x32xbf16, #tpu.memory_space<vmem>>, vector<16x32xbf16>
    %cst_38 = arith.constant dense<0.000000e+00> : vector<8x32xf32>
    %61 = tpu.matmul %59, %60, %cst_38 {dimension_numbers = #tpu.dot_dimension_numbers<[1], [0], [0], [1], [0, 0, 1, 1], [], []>} : vector<8x16xbf16>, vector<16x32xbf16>, vector<8x32xf32> -> vector<8x32xf32>
    %c0_39 = arith.constant 0 : index
    %c0_40 = arith.constant 0 : index
    %62 = vector.load %arg15[%c0_39, %c0_40] : memref<32x32xbf16, #tpu.memory_space<vmem>>, vector<32x32xbf16>
    %cst_41 = arith.constant dense<0.000000e+00> : vector<8x32xf32>
    %63 = tpu.matmul %34, %62, %cst_41 {dimension_numbers = #tpu.dot_dimension_numbers<[1], [0], [0], [1], [0, 0, 1, 1], [], []>} : vector<8x32xbf16>, vector<32x32xbf16>, vector<8x32xf32> -> vector<8x32xf32>
    %64 = arith.addf %61, %63 : vector<8x32xf32>
    %c0_42 = arith.constant 0 : index
    %c0_43 = arith.constant 0 : index
    %65 = vector.load %arg16[%c0_42, %c0_43] : memref<1x32xf32, #tpu.memory_space<vmem>>, vector<1x32xf32>
    %66 = vector.broadcast %65 : vector<1x32xf32> to vector<8x32xf32>
    %67 = arith.addf %64, %66 : vector<8x32xf32>
    %cst_44 = arith.constant 0.000000e+00 : f32
    %68 = vector.broadcast %cst_44 : f32 to vector<8x32xf32>
    %69 = arith.maximumf %67, %68 : vector<8x32xf32>
    %70 = arith.truncf %69 : vector<8x32xf32> to vector<8x32xbf16>
    %c0_45 = arith.constant 0 : index
    %c0_46 = arith.constant 0 : index
    %71 = vector.load %arg17[%c0_45, %c0_46] : memref<32x32xbf16, #tpu.memory_space<vmem>>, vector<32x32xbf16>
    %cst_47 = arith.constant dense<0.000000e+00> : vector<8x32xf32>
    %72 = tpu.matmul %70, %71, %cst_47 {dimension_numbers = #tpu.dot_dimension_numbers<[1], [0], [0], [1], [0, 0, 1, 1], [], []>} : vector<8x32xbf16>, vector<32x32xbf16>, vector<8x32xf32> -> vector<8x32xf32>
    %c0_48 = arith.constant 0 : index
    %c0_49 = arith.constant 0 : index
    %73 = vector.load %arg18[%c0_48, %c0_49] : memref<1x32xf32, #tpu.memory_space<vmem>>, vector<1x32xf32>
    %74 = vector.broadcast %73 : vector<1x32xf32> to vector<8x32xf32>
    %75 = arith.addf %72, %74 : vector<8x32xf32>
    %cst_50 = arith.constant 0.000000e+00 : f32
    %76 = vector.broadcast %cst_50 : f32 to vector<8x32xf32>
    %77 = arith.maximumf %75, %76 : vector<8x32xf32>
    %78 = arith.truncf %77 : vector<8x32xf32> to vector<8x32xbf16>
    %c0_51 = arith.constant 0 : index
    %c0_52 = arith.constant 0 : index
    %79 = vector.load %arg19[%c0_51, %c0_52] : memref<32x128xbf16, #tpu.memory_space<vmem>>, vector<32x128xbf16>
    %cst_53 = arith.constant dense<0.000000e+00> : vector<8x128xf32>
    %80 = tpu.matmul %78, %79, %cst_53 {dimension_numbers = #tpu.dot_dimension_numbers<[1], [0], [0], [1], [0, 0, 1, 1], [], []>} : vector<8x32xbf16>, vector<32x128xbf16>, vector<8x128xf32> -> vector<8x128xf32>
    %c0_54 = arith.constant 0 : index
    %c0_55 = arith.constant 0 : index
    %81 = vector.load %arg20[%c0_54, %c0_55] : memref<1x128xf32, #tpu.memory_space<vmem>>, vector<1x128xf32>
    %82 = vector.broadcast %81 : vector<1x128xf32> to vector<8x128xf32>
    %83 = arith.addf %80, %82 : vector<8x128xf32>
    %c0_56 = arith.constant 0 : index
    %c0_57 = arith.constant 0 : index
    %84 = vector.load %arg21[%c0_56, %c0_57] : memref<8x128xf32, #tpu.memory_space<vmem>>, vector<8x128xf32>
    tpu.vector_store %arg21[%c0_56, %c0_57], %83 {strides = array<i32>} : memref<8x128xf32, #tpu.memory_space<vmem>>, vector<8x128xf32>,
    return
  }
  func.func @transform_0(%arg0: i32) -> (i32, i32) {
    %c0_i32 = arith.constant 0 : i32
    %c0_i32_0 = arith.constant 0 : i32
    return %arg0, %c0_i32 : i32, i32
  }
  func.func @transform_1(%arg0: i32) -> (i32, i32) {
    %c0_i32 = arith.constant 0 : i32
    %c0_i32_0 = arith.constant 0 : i32
    return %arg0, %c0_i32 : i32, i32
  }
  func.func @transform_2(%arg0: i32) -> (i32, i32) {
    %c0_i32 = arith.constant 0 : i32
    %c0_i32_0 = arith.constant 0 : i32
    %c0_i32_1 = arith.constant 0 : i32
    return %c0_i32, %c0_i32_0 : i32, i32
  }
  func.func @transform_3(%arg0: i32) -> (i32, i32) {
    %c0_i32 = arith.constant 0 : i32
    %c0_i32_0 = arith.constant 0 : i32
    %c0_i32_1 = arith.constant 0 : i32
    return %c0_i32, %c0_i32_0 : i32, i32
  }
  func.func @transform_4(%arg0: i32) -> (i32, i32) {
    %c0_i32 = arith.constant 0 : i32
    %c0_i32_0 = arith.constant 0 : i32
    %c0_i32_1 = arith.constant 0 : i32
    return %c0_i32, %c0_i32_0 : i32, i32
  }
  func.func @transform_5(%arg0: i32) -> (i32, i32) {
    %c0_i32 = arith.constant 0 : i32
    %c0_i32_0 = arith.constant 0 : i32
    %c0_i32_1 = arith.constant 0 : i32
    return %c0_i32, %c0_i32_0 : i32, i32
  }
  func.func @transform_6(%arg0: i32) -> (i32, i32) {
    %c0_i32 = arith.constant 0 : i32
    %c0_i32_0 = arith.constant 0 : i32
    %c0_i32_1 = arith.constant 0 : i32
    return %c0_i32, %c0_i32_0 : i32, i32
  }
  func.func @transform_7(%arg0: i32) -> (i32, i32) {
    %c0_i32 = arith.constant 0 : i32
    %c0_i32_0 = arith.constant 0 : i32
    %c0_i32_1 = arith.constant 0 : i32
    return %c0_i32, %c0_i32_0 : i32, i32
  }
  func.func @transform_8(%arg0: i32) -> (i32, i32) {
    %c0_i32 = arith.constant 0 : i32
    %c0_i32_0 = arith.constant 0 : i32
    %c0_i32_1 = arith.constant 0 : i32
    return %c0_i32, %c0_i32_0 : i32, i32
  }
  func.func @transform_9(%arg0: i32) -> (i32, i32) {
    %c0_i32 = arith.constant 0 : i32
    %c0_i32_0 = arith.constant 0 : i32
    %c0_i32_1 = arith.constant 0 : i32
    return %c0_i32, %c0_i32_0 : i32, i32
  }
  func.func @transform_10(%arg0: i32) -> (i32, i32) {
    %c0_i32 = arith.constant 0 : i32
    %c0_i32_0 = arith.constant 0 : i32
    %c0_i32_1 = arith.constant 0 : i32
    return %c0_i32, %c0_i32_0 : i32, i32
  }
  func.func @transform_11(%arg0: i32) -> (i32, i32) {
    %c0_i32 = arith.constant 0 : i32
    %c0_i32_0 = arith.constant 0 : i32
    %c0_i32_1 = arith.constant 0 : i32
    return %c0_i32, %c0_i32_0 : i32, i32
  }
  func.func @transform_12(%arg0: i32) -> (i32, i32) {
    %c0_i32 = arith.constant 0 : i32
    %c0_i32_0 = arith.constant 0 : i32
    %c0_i32_1 = arith.constant 0 : i32
    return %c0_i32, %c0_i32_0 : i32, i32
  }
  func.func @transform_13(%arg0: i32) -> (i32, i32) {
    %c0_i32 = arith.constant 0 : i32
    %c0_i32_0 = arith.constant 0 : i32
    %c0_i32_1 = arith.constant 0 : i32
    return %c0_i32, %c0_i32_0 : i32, i32
  }
  func.func @transform_14(%arg0: i32) -> (i32, i32) {
    %c0_i32 = arith.constant 0 : i32
    %c0_i32_0 = arith.constant 0 : i32
    %c0_i32_1 = arith.constant 0 : i32
    return %c0_i32, %c0_i32_0 : i32, i32
  }
  func.func @transform_15(%arg0: i32) -> (i32, i32) {
    %c0_i32 = arith.constant 0 : i32
    %c0_i32_0 = arith.constant 0 : i32
    %c0_i32_1 = arith.constant 0 : i32
    return %c0_i32, %c0_i32_0 : i32, i32
  }
  func.func @transform_16(%arg0: i32) -> (i32, i32) {
    %c0_i32 = arith.constant 0 : i32
    %c0_i32_0 = arith.constant 0 : i32
    %c0_i32_1 = arith.constant 0 : i32
    return %c0_i32, %c0_i32_0 : i32, i32
  }
  func.func @transform_17(%arg0: i32) -> (i32, i32) {
    %c0_i32 = arith.constant 0 : i32
    %c0_i32_0 = arith.constant 0 : i32
    %c0_i32_1 = arith.constant 0 : i32
    return %c0_i32, %c0_i32_0 : i32, i32
  }
  func.func @transform_18(%arg0: i32) -> (i32, i32) {
    %c0_i32 = arith.constant 0 : i32
    %c0_i32_0 = arith.constant 0 : i32
    %c0_i32_1 = arith.constant 0 : i32
    return %c0_i32, %c0_i32_0 : i32, i32
  }
  func.func @transform_19(%arg0: i32) -> (i32, i32) {
    %c0_i32 = arith.constant 0 : i32
    %c0_i32_0 = arith.constant 0 : i32
    %c0_i32_1 = arith.constant 0 : i32
    return %c0_i32, %c0_i32_0 : i32, i32
  }
  func.func @transform_20(%arg0: i32) -> (i32, i32) {
    %c0_i32 = arith.constant 0 : i32
    %c0_i32_0 = arith.constant 0 : i32
    return %arg0, %c0_i32 : i32, i32
  }
}

</mosaic_0001>

<bundles_post_ra>
// kernel: tpu_custom_call.1
= control target key start
LH: loop header
LB: loop body
LE: loop exit
PB: predicated region body
PF: predicated region fallthrough
CT: control target
= control target key end

     0   :  { %s1673_s0 = inlined_call_operand.hbm [shape: f32[8,8], index: 0, kind: input, shape index: {}]   ;;  %s1674_s1 = inlined_call_operand.hbm [shape: f32[8,32], index: 1, kind: input, shape index: {}]   ;;  %s1675_s2 = inlined_call_operand.vmem [shape: bf16[32,32], index: 2, kind: input, shape index: {}]   ;;  %s1676_s3 = inlined_call_operand.hbm [shape: f32[1,32], index: 3, kind: input, shape index: {}]   ;;  %s1677_s4 = inlined_call_operand.hbm [shape: f32[1,32], index: 4, kind: input, shape index: {}]   ;;  %s1678_s5 = inlined_call_operand.hbm [shape: f32[1,32], index: 5, kind: input, shape index: {}]   ;;  %s1679_s6 = inlined_call_operand.hbm [shape: bf16[8,32], index: 6, kind: input, shape index: {}]   ;;  %s1680_s7 = inlined_call_operand.vmem [shape: bf16[32,32], index: 7, kind: input, shape index: {}]   ;;  %s1681_s8 = inlined_call_operand.hbm [shape: f32[1,32], index: 8, kind: input, shape index: {}]   ;;  %s1682_s9 = inlined_call_operand.vmem [shape: bf16[32,32], index: 9, kind: input, shape index: {}]   ;;  %s1683_s10 = inlined_call_operand.hbm [shape: f32[1,32], index: 10, kind: input, shape index: {}]   ;;  %s1684_s11 = inlined_call_operand.vmem [shape: bf16[32,16], index: 11, kind: input, shape index: {}]   ;;  %s1685_s12 = inlined_call_operand.hbm [shape: f32[1,16], index: 12, kind: input, shape index: {}]   ;;  %s1686_s13 = inlined_call_operand.hbm [shape: bf16[16,32], index: 13, kind: input, shape index: {}]   ;;  %s1687_s14 = inlined_call_operand.vmem [shape: bf16[32,32], index: 14, kind: input, shape index: {}]   ;;  %s1688_s15 = inlined_call_operand.hbm [shape: f32[1,32], index: 15, kind: input, shape index: {}]   ;;  %s1689_s16 = inlined_call_operand.vmem [shape: bf16[32,32], index: 16, kind: input, shape index: {}]   ;;  %s1690_s17 = inlined_call_operand.vmem [shape: f32[1,32], index: 17, kind: input, shape index: {}]   ;;  %s1691_s18 = inlined_call_operand.hbm [shape: bf16[32,128], index: 18, kind: input, shape index: {}]   ;;  %s1692_s19 = inlined_call_operand.vmem [shape: f32[1,128], index: 19, kind: input, shape index: {}]   ;;  %s1693_s20 = inlined_call_operand.hbm [shape: f32[8,128], index: 20, kind: output, shape index: {}]  }
   0x1   :  { %1699 = sst [smem:[#allocation31_spill]] %s1673_s0 }
   0x2   :  { %1700 = sst [smem:[#allocation32_spill]] %s1674_s1 }
   0x3   :  { %1701 = sst [smem:[#allocation33_spill]] %s1675_s2 }
   0x4   :  { %1702 = sst [smem:[#allocation34_spill]] %s1676_s3 }
   0x5   :  { %1703 = sst [smem:[#allocation35_spill]] %s1677_s4 }
   0x6   :  { %25 = vsyncpa [#allocation3], 0 }
   0x7   :  { %26 = vsyncpa [#allocation6], 0 }
   0x8   :  { %27 = vsyncpa [#allocation9], 0 }
   0x9   :  { %28 = vsyncpa [#allocation12], 0 }
   0xa   :  { %29 = vsyncpa [#allocation15], 0 }
   0xb   :  { %30 = vsyncpa [#allocation18], 0 }
   0xc   :  { %31 = vsyncpa [#allocation21], 0 }
   0xd   :  { %32 = vsyncpa [#allocation4], 0  ;;  %s1304_s1 = smov [#allocation5]   ;;  %s1305_s23 = smov [#allocation8]  }
   0xe   :  { %s49_s22 = sshll.u32 %s1304_s1, 4  ;;  %s71_s24 = sshll.u32 %s1305_s23, 4  ;;  %s50_s22 = int_to_ptr.vmem [resolvable:$true] %s49_s22  ;;  %s72_s24 = int_to_ptr.vmem [resolvable:$true] %s71_s24 }
   0xf   :  { %s1704_s3 = sld [smem:[#allocation32_spill]] }
  0x15   :  { %s1002_s26 = scalar_lea.hbm %s1704_s3, 128 }
  0x16   :  { %p1003_p0 = scmp.ne.s32.totalorder %s1704_s3, %s1002_s26  ;;  %p1006_p1 = scmp.lt.u32.totalorder %s1002_s26, %s1704_s3 }
  0x18   :  { %p1008_p2 = pnand %p1006_p1, %p1003_p0 }
  0x1a   :  { %1011 = shalt.err (!%p1008_p2)
}
  0x1b   :  { %s1012_s30 = scalar_lea.vmem %s50_s22, 128  ;;  %p1017_p4 = scmp.lt.s32.totalorder %s50_s22, %s50_s22 }
  0x1c   :  { %p1013_p3 = scmp.ne.s32.totalorder %s50_s22, %s1012_s30  ;;  %p1018_p5 = scmp.lt.s32.totalorder %s1012_s30, %s1012_s30 }
  0x1e   :  { %p1019_p6 = por %p1018_p5, %p1017_p4 }
  0x20   :  { %p1020_p7 = pnand %p1019_p6, %p1013_p3 }
  0x22   :  { %1023 = shalt.err (!%p1020_p7)
}
  0x23   :  { %52 = dma.hbm_to_vmem [thread:$0]  %s1704_s3, 128, %s50_s22, [#allocation6]  }
  0x24   :  { %s1705_s2 = sld [smem:[#allocation35_spill]] }
  0x2a   :  { %s1024_s25 = scalar_lea.hbm %s1705_s2, 16 }
  0x2b   :  { %p1025_p8 = scmp.ne.s32.totalorder %s1705_s2, %s1024_s25  ;;  %p1028_p9 = scmp.lt.u32.totalorder %s1024_s25, %s1705_s2 }
  0x2d   :  { %p1030_p10 = pnand %p1028_p9, %p1025_p8 }
  0x2f   :  { %1033 = shalt.err (!%p1030_p10)
}
  0x30   :  { %s1034_s29 = scalar_lea.vmem %s72_s24, 16  ;;  %s1038_s30 = scalar_lea.vmem %s72_s24, 32 }
  0x31   :  { %p1035_p11 = scmp.ne.s32.totalorder %s72_s24, %s1034_s29  ;;  %p1039_p12 = scmp.lt.s32.totalorder %s72_s24, %s72_s24 }
  0x32   :  { %p1040_p13 = scmp.lt.s32.totalorder %s1038_s30, %s1034_s29 }
  0x34   :  { %p1041_p0 = por %p1040_p13, %p1039_p12 }
  0x36   :  { %p1042_p1 = pnand %p1041_p0, %p1035_p11 }
  0x38   :  { %1045 = shalt.err (!%p1042_p1)
}
  0x39   :  { %74 = dma.hbm_to_vmem [thread:$0]  %s1705_s2, 16, %s72_s24, [#allocation9]  }
  0x3a   :  { %s1306_s0 = smov [#allocation11]   ;;  %s1307_s1 = smov [#allocation14]  }
  0x3b   :  { %s91_s21 = sshll.u32 %s1306_s0, 4  ;;  %s115_s23 = sshll.u32 %s1307_s1, 4  ;;  %s92_s21 = int_to_ptr.vmem [resolvable:$true] %s91_s21  ;;  %s116_s23 = int_to_ptr.vmem [resolvable:$true] %s115_s23 }
  0x3c   :  { %s1046_s28 = scalar_lea.hbm %s1679_s6, 64 }
  0x3d   :  { %p1047_p2 = scmp.ne.s32.totalorder %s1679_s6, %s1046_s28  ;;  %p1050_p3 = scmp.lt.u32.totalorder %s1046_s28, %s1679_s6 }
  0x3f   :  { %p1052_p4 = pnand %p1050_p3, %p1047_p2 }
  0x41   :  { %1055 = shalt.err (!%p1052_p4)
}
  0x42   :  { %s1056_s24 = scalar_lea.vmem %s92_s21, 64  ;;  %p1061_p6 = scmp.lt.s32.totalorder %s92_s21, %s92_s21 }
  0x43   :  { %p1057_p5 = scmp.ne.s32.totalorder %s92_s21, %s1056_s24  ;;  %p1062_p7 = scmp.lt.s32.totalorder %s1056_s24, %s1056_s24 }
  0x45   :  { %p1063_p8 = por %p1062_p7, %p1061_p6 }
  0x47   :  { %p1064_p9 = pnand %p1063_p8, %p1057_p5 }
  0x49   :  { %1067 = shalt.err (!%p1064_p9)
}
  0x4a   :  { %94 = dma.hbm_to_vmem [thread:$0]  %s1679_s6, 64, %s92_s21, [#allocation12]  }
  0x4b   :  { %s1068_s1 = scalar_lea.hbm %s1683_s10, 16 }
  0x4c   :  { %p1069_p10 = scmp.ne.s32.totalorder %s1683_s10, %s1068_s1  ;;  %p1072_p11 = scmp.lt.u32.totalorder %s1068_s1, %s1683_s10 }
  0x4e   :  { %p1074_p12 = pnand %p1072_p11, %p1069_p10 }
  0x50   :  { %1077 = shalt.err (!%p1074_p12)
}
  0x51   :  { %s1078_s4 = scalar_lea.vmem %s116_s23, 16  ;;  %s1082_s29 = scalar_lea.vmem %s116_s23, 32 }
  0x52   :  { %p1079_p13 = scmp.ne.s32.totalorder %s116_s23, %s1078_s4  ;;  %p1083_p0 = scmp.lt.s32.totalorder %s116_s23, %s116_s23 }
  0x53   :  { %p1084_p1 = scmp.lt.s32.totalorder %s1082_s29, %s1078_s4 }
  0x55   :  { %p1085_p2 = por %p1084_p1, %p1083_p0 }
  0x57   :  { %p1086_p3 = pnand %p1085_p2, %p1079_p13 }
  0x59   :  { %1089 = shalt.err (!%p1086_p3)
}
  0x5a   :  { %118 = dma.hbm_to_vmem [thread:$0]  %s1683_s10, 16, %s116_s23, [#allocation15]  }
  0x5b   :  { %s1308_s30 = smov [#allocation17]   ;;  %s1090_s3 = scalar_lea.hbm %s1686_s13, 128 }
  0x5c   :  { %s136_s24 = sshll.u32 %s1308_s30, 4  ;;  %p1091_p4 = scmp.ne.s32.totalorder %s1686_s13, %s1090_s3  ;;  %s137_s24 = int_to_ptr.vmem [resolvable:$true] %s136_s24 }
  0x5d   :  { %p1094_p5 = scmp.lt.u32.totalorder %s1090_s3, %s1686_s13 }
  0x5f   :  { %p1096_p6 = pnand %p1094_p5, %p1091_p4 }
  0x61   :  { %1099 = shalt.err (!%p1096_p6)
}
  0x62   :  { %s1100_s28 = scalar_lea.vmem %s137_s24, 128  ;;  %p1105_p8 = scmp.lt.s32.totalorder %s137_s24, %s137_s24 }
  0x63   :  { %p1101_p7 = scmp.ne.s32.totalorder %s137_s24, %s1100_s28  ;;  %p1106_p9 = scmp.lt.s32.totalorder %s1100_s28, %s1100_s28 }
  0x65   :  { %p1107_p10 = por %p1106_p9, %p1105_p8 }
  0x67   :  { %p1108_p11 = pnand %p1107_p10, %p1101_p7 }
  0x69   :  { %1111 = shalt.err (!%p1108_p11)
}
  0x6a   :  { %s1309_s10 = smov 64   ;;  %s1310_s23 = smov 4  }
  0x6b   :  { %142 = dma.hbm_to_vmem [thread:$0]  %s1686_s13, 128, %s137_s24, [#allocation18], %s1309_s10, %s1309_s10, %s1310_s23  }
  0x6c   :  { %s1311_s29 = smov [#allocation2]   ;;  %s1312_s21 = smov [#allocation7]  }
  0x6d   :  { %s39_s6 = sshll.u32 %s1311_s29, 4  ;;  %s61_s30 = sshll.u32 %s1312_s21, 4  ;;  %s40_s6 = int_to_ptr.vmem [resolvable:$true] %s39_s6  ;;  %s62_s30 = int_to_ptr.vmem [resolvable:$true] %s61_s30 }
  0x6e   :  { %s1706_s3 = sld [smem:[#allocation31_spill]] }
  0x74   :  { %s1112_s0 = scalar_lea.hbm %s1706_s3, 128 }
  0x75   :  { %p1113_p12 = scmp.ne.s32.totalorder %s1706_s3, %s1112_s0  ;;  %p1116_p13 = scmp.lt.u32.totalorder %s1112_s0, %s1706_s3 }
  0x77   :  { %p1118_p0 = pnand %p1116_p13, %p1113_p12 }
  0x79   :  { %1121 = shalt.err (!%p1118_p0)
}
  0x7a   :  { %s1122_s13 = scalar_lea.vmem %s40_s6, 128  ;;  %p1127_p2 = scmp.lt.s32.totalorder %s40_s6, %s40_s6 }
  0x7b   :  { %p1123_p1 = scmp.ne.s32.totalorder %s40_s6, %s1122_s13  ;;  %p1128_p3 = scmp.lt.s32.totalorder %s1122_s13, %s1122_s13 }
  0x7d   :  { %p1129_p4 = por %p1128_p3, %p1127_p2 }
  0x7f   :  { %p1130_p5 = pnand %p1129_p4, %p1123_p1 }
  0x81   :  { %1133 = shalt.err (!%p1130_p5)
}
  0x82   :  { %42 = dma.hbm_to_vmem [thread:$0]  %s1706_s3, 128, %s40_s6, [#allocation3]  }
  0x83   :  { %s1707_s21 = sld [smem:[#allocation34_spill]] }
  0x89   :  { %s1134_s2 = scalar_lea.hbm %s1707_s21, 16 }
  0x8a   :  { %p1135_p6 = scmp.ne.s32.totalorder %s1707_s21, %s1134_s2  ;;  %p1138_p7 = scmp.lt.u32.totalorder %s1134_s2, %s1707_s21 }
  0x8c   :  { %p1140_p8 = pnand %p1138_p7, %p1135_p6 }
  0x8e   :  { %1143 = shalt.err (!%p1140_p8)
}
  0x8f   :  { %s1144_s27 = scalar_lea.vmem %s62_s30, 16  ;;  %s1148_s28 = scalar_lea.vmem %s62_s30, 32 }
  0x90   :  { %p1145_p9 = scmp.ne.s32.totalorder %s62_s30, %s1144_s27  ;;  %p1149_p10 = scmp.lt.s32.totalorder %s62_s30, %s62_s30 }
  0x91   :  { %p1150_p11 = scmp.lt.s32.totalorder %s1148_s28, %s1144_s27 }
  0x93   :  { %p1151_p12 = por %p1150_p11, %p1149_p10 }
  0x95   :  { %p1152_p13 = pnand %p1151_p12, %p1145_p9 }
  0x97   :  { %1155 = shalt.err (!%p1152_p13)
}
  0x98   :  { %64 = dma.hbm_to_vmem [thread:$0]  %s1707_s21, 16, %s62_s30, [#allocation6]  }
  0x99   :  { %s1313_s13 = smov [#allocation10]   ;;  %s1314_s26 = smov [#allocation13]  }
  0x9a   :  { %s81_s24 = sshll.u32 %s1313_s13, 4  ;;  %s103_s4 = sshll.u32 %s1314_s26, 4  ;;  %s82_s24 = int_to_ptr.vmem [resolvable:$true] %s81_s24  ;;  %s104_s4 = int_to_ptr.vmem [resolvable:$true] %s103_s4 }
  0x9b   :  { %s1156_s22 = scalar_lea.hbm %s1678_s5, 16 }
  0x9c   :  { %p1157_p0 = scmp.ne.s32.totalorder %s1678_s5, %s1156_s22  ;;  %p1160_p1 = scmp.lt.u32.totalorder %s1156_s22, %s1678_s5 }
  0x9e   :  { %p1162_p2 = pnand %p1160_p1, %p1157_p0 }
  0xa0   :  { %1165 = shalt.err (!%p1162_p2)
}
  0xa1   :  { %s1166_s30 = scalar_lea.vmem %s82_s24, 16  ;;  %s1170_s21 = scalar_lea.vmem %s82_s24, 32 }
  0xa2   :  { %p1167_p3 = scmp.ne.s32.totalorder %s82_s24, %s1166_s30  ;;  %p1171_p4 = scmp.lt.s32.totalorder %s82_s24, %s82_s24 }
  0xa3   :  { %p1172_p5 = scmp.lt.s32.totalorder %s1170_s21, %s1166_s30 }
  0xa5   :  { %p1173_p6 = por %p1172_p5, %p1171_p4 }
  0xa7   :  { %p1174_p7 = pnand %p1173_p6, %p1167_p3 }
  0xa9   :  { %1177 = shalt.err (!%p1174_p7)
}
  0xaa   :  { %84 = dma.hbm_to_vmem [thread:$0]  %s1678_s5, 16, %s82_s24, [#allocation9]  }
  0xab   :  { %s1178_s26 = scalar_lea.hbm %s1681_s8, 16 }
  0xac   :  { %p1179_p8 = scmp.ne.s32.totalorder %s1681_s8, %s1178_s26  ;;  %p1182_p9 = scmp.lt.u32.totalorder %s1178_s26, %s1681_s8 }
  0xae   :  { %p1184_p10 = pnand %p1182_p9, %p1179_p8 }
  0xb0   :  { %1187 = shalt.err (!%p1184_p10)
}
  0xb1   :  { %s1188_s1 = scalar_lea.vmem %s104_s4, 16  ;;  %s1192_s25 = scalar_lea.vmem %s104_s4, 32 }
  0xb2   :  { %p1189_p11 = scmp.ne.s32.totalorder %s104_s4, %s1188_s1  ;;  %p1193_p12 = scmp.lt.s32.totalorder %s104_s4, %s104_s4 }
  0xb3   :  { %p1194_p13 = scmp.lt.s32.totalorder %s1192_s25, %s1188_s1 }
  0xb5   :  { %p1195_p0 = por %p1194_p13, %p1193_p12 }
  0xb7   :  { %p1196_p1 = pnand %p1195_p0, %p1189_p11 }
  0xb9   :  { %1199 = shalt.err (!%p1196_p1)
}
  0xba   :  { %106 = dma.hbm_to_vmem [thread:$0]  %s1681_s8, 16, %s104_s4, [#allocation12]  }
  0xbb   :  { %s1315_s27 = smov [#allocation16]   ;;  %s1316_s21 = smov [#allocation19]  }
  0xbc   :  { %s127_s30 = sshll.u32 %s1315_s27, 4  ;;  %s151_s28 = sshll.u32 %s1316_s21, 4  ;;  %s128_s30 = int_to_ptr.vmem [resolvable:$true] %s127_s30  ;;  %s152_s28 = int_to_ptr.vmem [resolvable:$true] %s151_s28 }
  0xbd   :  { %s1200_s13 = scalar_lea.hbm %s1685_s12, 16 }
  0xbe   :  { %p1201_p2 = scmp.ne.s32.totalorder %s1685_s12, %s1200_s13  ;;  %p1204_p3 = scmp.lt.u32.totalorder %s1200_s13, %s1685_s12 }
  0xc0   :  { %p1206_p4 = pnand %p1204_p3, %p1201_p2 }
  0xc2   :  { %1209 = shalt.err (!%p1206_p4)
}
  0xc3   :  { %s1210_s8 = scalar_lea.vmem %s128_s30, 16  ;;  %s1214_s4 = scalar_lea.vmem %s128_s30, 32 }
  0xc4   :  { %p1211_p5 = scmp.ne.s32.totalorder %s128_s30, %s1210_s8  ;;  %p1215_p6 = scmp.lt.s32.totalorder %s128_s30, %s128_s30 }
  0xc5   :  { %p1216_p7 = scmp.lt.s32.totalorder %s1214_s4, %s1210_s8 }
  0xc7   :  { %p1217_p8 = por %p1216_p7, %p1215_p6 }
  0xc9   :  { %p1218_p9 = pnand %p1217_p8, %p1211_p5 }
  0xcb   :  { %1221 = shalt.err (!%p1218_p9)
}
  0xcc   :  { %130 = dma.hbm_to_vmem [thread:$0]  %s1685_s12, 16, %s128_s30, [#allocation15]  }
  0xcd   :  { %s1222_s24 = scalar_lea.hbm %s1688_s15, 16 }
  0xce   :  { %p1223_p10 = scmp.ne.s32.totalorder %s1688_s15, %s1222_s24  ;;  %p1226_p11 = scmp.lt.u32.totalorder %s1222_s24, %s1688_s15 }
  0xd0   :  { %p1228_p12 = pnand %p1226_p11, %p1223_p10 }
  0xd2   :  { %1231 = shalt.err (!%p1228_p12)
}
  0xd3   :  { %s1232_s13 = scalar_lea.vmem %s152_s28, 16  ;;  %s1236_s26 = scalar_lea.vmem %s152_s28, 32 }
  0xd4   :  { %p1233_p13 = scmp.ne.s32.totalorder %s152_s28, %s1232_s13  ;;  %p1237_p0 = scmp.lt.s32.totalorder %s152_s28, %s152_s28 }
  0xd5   :  { %p1238_p1 = scmp.lt.s32.totalorder %s1236_s26, %s1232_s13 }
  0xd7   :  { %p1239_p2 = por %p1238_p1, %p1237_p0 }
  0xd9   :  { %p1240_p3 = pnand %p1239_p2, %p1233_p13 }
  0xdb   :  { %1243 = shalt.err (!%p1240_p3)
}
  0xdc   :  { %154 = dma.hbm_to_vmem [thread:$0]  %s1688_s15, 16, %s152_s28, [#allocation18]  }
  0xdd   :  { %s1317_s29 = smov [#allocation20]   ;;  %s1244_s4 = scalar_lea.hbm %s1691_s18, 256 }
  0xde   :  { %s164_s2 = sshll.u32 %s1317_s29, 4  ;;  %p1245_p4 = scmp.ne.s32.totalorder %s1691_s18, %s1244_s4  ;;  %s165_s2 = int_to_ptr.vmem [resolvable:$true] %s164_s2 }
  0xdf   :  { %p1248_p5 = scmp.lt.u32.totalorder %s1244_s4, %s1691_s18 }
  0xe1   :  { %p1250_p6 = pnand %p1248_p5, %p1245_p4 }
  0xe3   :  { %1253 = shalt.err (!%p1250_p6)
}
  0xe4   :  { %s1254_s24 = scalar_lea.vmem %s165_s2, 256  ;;  %p1259_p8 = scmp.lt.s32.totalorder %s165_s2, %s165_s2 }
  0xe5   :  { %p1255_p7 = scmp.ne.s32.totalorder %s165_s2, %s1254_s24  ;;  %p1260_p9 = scmp.lt.s32.totalorder %s1254_s24, %s1254_s24 }
  0xe7   :  { %p1261_p10 = por %p1260_p9, %p1259_p8 }
  0xe9   :  { %p1262_p11 = pnand %p1261_p10, %p1255_p7 }
  0xeb   :  { %1265 = shalt.err (!%p1262_p11)
}
  0xec   :  { %170 = dma.hbm_to_vmem [thread:$0]  %s1691_s18, 256, %s165_s2, [#allocation21], %s1309_s10, %s1309_s10, %s1310_s23  }
  0xed   :  { %1288 = dma.done.wait [#allocation3], 128  }
  0xee   :  { %1289 = vsyncadd [#allocation3], 4294967168 }
  0xef   :  { %1290 = dma.done.wait [#allocation6], 144  }
  0xf0   :  { %1291 = vsyncadd [#allocation6], 4294967152 }
  0xf1   :  { %1292 = dma.done.wait [#allocation9], 32  }
  0xf2   :  { %1293 = vsyncadd [#allocation9], 4294967264 }
  0xf3   :  { %1294 = dma.done.wait [#allocation12], 80  }
  0xf4   :  { %1295 = vsyncadd [#allocation12], 4294967216 }
  0xf5   :  { %1296 = dma.done.wait [#allocation15], 32  }
  0xf6   :  { %1297 = vsyncadd [#allocation15], 4294967264 }
  0xf7   :  { %1298 = dma.done.wait [#allocation18], 144  }
  0xf8   :  { %1299 = vsyncadd [#allocation18], 4294967152 }
  0xf9   :  { %1300 = dma.done.wait [#allocation21], 256  }
  0xfa   :  { %1301 = vsyncadd [#allocation21], 4294967040  ;;  %v1318_v0 = vmov 0.0   ;;  %vm1319_vm0 = vmmov 0   ;;  %s1708_s23 = sld [smem:[#allocation33_spill]]  ;;  %v212_v3 = vld [vmem:[#allocation5] sm:$0xff] }
  0xfb   :  { %898 = vmatprep.subr.bf16.mxu0 %v1318_v0  ;;  %902 = vmatprep.mubr.msk.bf16.mxu0 %vm1319_vm0, %v1318_v0  ;;  %vm237_vm1 = vcmask 261120   ;;  %v213_v4 = vpack.c.bf16 %v212_v3, %v212_v3  ;;  %v840_v5 = vld [vmem:[#allocation7] ss:$0 sm:$0xff]  ;;  %v313_v17 = vld [vmem:[#allocation11] sm:$0xf]  ;;  %vm377_vm2 = vcmask 1043456  }
  0xfc   :  { %906 = vmatprep.subr.bf16.mxu1 %v1318_v0  ;;  %910 = vmatprep.mubr.msk.bf16.mxu1 %vm1319_vm0, %v1318_v0  ;;  %v985_v18 = vld [vmem:[%s1680_s7] sm:$0xff]   ;;  %v379_v19 = vsel %vm377_vm2, %v313_v17, 0  ;;  %v986_v21 = vld [vmem:[%s1680_s7 + $0x8] sm:$0xff]   ;;  %vm373_vm3 = vcmask 64512   ;;  %v844_v27 = vld [vmem:[#allocation8] ss:$0 sm:$0xff] }
  0xfd   :  { %v210_v20 = vld [vmem:[#allocation2] sm:$0xff]  ;;  %907 = vmatpush3.bf16.msra.mxu1 %v985_v18  ;;  %v845_v29 = vld [vmem:[#allocation10] ss:$0 sm:$0xff]  ;;  %v988_v39 = vld [vmem:[%s1682_s9 + $0x8] sm:$0xff]   ;;  %vm630_vm4 = vcmask 130048   ;;  %s1320_s10 = smov [#allocation22]  }
  0xfe   :  { %v211_v22 = vpack.c.bf16 %v210_v20, %v210_v20  ;;  %908 = vmatprep.subr.bf16.mxu1 %v1318_v0  ;;  %v987_v38 = vld [vmem:[%s1682_s9] sm:$0xff]   ;;  %v850_v42 = vld [vmem:[#allocation13] ss:$0 sm:$0xff]  ;;  %v990_v51 = vld [vmem:[%s1687_s14 + $0x8] sm:$0xff]  }
  0xff   :  { %v991_v40 = vld [vmem:[%s1684_s11] sm:$0xff]   ;;  %v992_v52 = vld [vmem:[%s1684_s11 + $0x8] sm:$0xff]   ;;  %v851_v53 = vld [vmem:[#allocation14] ss:$0 sm:$0xff] }
 0x100   :  { %v983_v1 = vld [vmem:[%s1708_s23] sm:$0xff]   ;;  %v984_v2 = vld [vmem:[%s1708_s23 + $0x8] sm:$0xff]   ;;  %v855_v3 = vld [vmem:[#allocation16] ss:$0 sm:$0xff]  ;;  %s825_s23 = sshll.u32 %s1320_s10, 4  ;;  %s826_s23 = int_to_ptr.vmem [resolvable:$true] %s825_s23 }
 0x101   :  { %899 = vmatpush3.bf16.msra.mxu0 %v983_v1  ;;  %909 = vmatpush3.bf16.msra.mxu1 %v986_v21  ;;  %v989_v49 = vld [vmem:[%s1687_s14] sm:$0xff]   ;;  %p1271_p13 = scmp.lt.s32.totalorder %s826_s23, %s826_s23 }
 0x102   :  { %900 = vmatprep.subr.bf16.mxu0 %v1318_v0  ;;  %920 = vmatprep.subr.bf16.mxu1 %v1318_v0  ;;  %v993_v60 = vld [vmem:[#allocation17] sm:$0xff]  }
 0x105   :  { %901 = vmatpush3.bf16.msra.mxu0 %v984_v2 }
 0x106   :  { %914 = vmatprep.subr.bf16.mxu0 %v1318_v0 }
 0x108   :  { %903 = vmatmul.mubr.msk.bf16.vlgmr.msra.gmra.mrb[0].mxu0 %vm237_vm1, %v213_v4 }
 0x109   :  { %916 = vmatprep.mubr.msk.bf16.mxu0 %vm1319_vm0, %v1318_v0  ;;  %915 = vmatpush3.bf16.msra.mxu0 %v379_v19 }
 0x10a   :  { %928 = vmatprep.subr.bf16.mxu0 %v1318_v0 }
 0x110   :  { %917 = vmatmul.mubr.msk.bf16.vlgmr.msra.gmra.mrb[4].mxu0 %vm373_vm3, %v211_v22  ;;  %v997_v22 = vld [vmem:[#allocation20 + $0x8] sm:$0xff]  }
 0x111   :  { %932 = vmatprep.mubr.msk.bf16.mxu0 %vm1319_vm0, %v1318_v0  ;;  %929 = vmatpush3.bf16.msra.mxu0 %v991_v40 }
 0x112   :  { %930 = vmatprep.subr.bf16.mxu0 %v1318_v0 }
 0x115   :  { %931 = vmatpush3.bf16.msra.mxu0 %v992_v52 }
 0x116   :  { %944 = vmatprep.subr.bf16.mxu0 %v1318_v0 }
 0x1db   :  { %v275_v6 = vpop.f32.mrb[0].mxu0 }
 0x1dc   :  { %v276_v7 = vadd.f32 %v840_v5, %v275_v6  ;;  %v904_v8 = vpop.f32.mrb[1].mxu0 }
 0x1dd   :  { %v278_v9 = vpop.f32.mrb[2].mxu0 }
 0x1de   :  { %v905_v10 = vpop.f32.mrb[3].mxu0  ;;  %v281_v11 = vsel %vm237_vm1, %v276_v7, 0.0 }
 0x1df   :  { %282 = vadd.xlane.f32.xlu0 %v281_v11  ;;  %v994_v10 = vld [vmem:[%s1689_s16] sm:$0xff]   ;;  %v995_v11 = vld [vmem:[%s1689_s16 + $0x8] sm:$0xff]  }
 0x1e3   :  { %v415_v34 = vpop.f32.mrb[4].mxu0 }
 0x1e4   :  { %v918_v35 = vpop.f32.mrb[5].mxu0 }
 0x1e5   :  { %v418_v36 = vpop.f32.mrb[6].mxu0 }
 0x1e6   :  { %v919_v37 = vpop.f32.mrb[7].mxu0 }
 0x26c   :  { %v283_v12 = vpop.xlane.xlu0 %282 }
 0x26d   :  { %v285_v13 = vmul.f32 0.03125, %v283_v12  ;;  %v996_v12 = vld [vmem:[#allocation20] sm:$0xff]  }
 0x26f   :  { %v286_v14 = vsub.f32 %v276_v7, %v285_v13 }
 0x271   :  { %v287_v15 = vmul.f32 %v286_v14, %v286_v14 }
 0x273   :  { %v288_v16 = vsel %vm237_vm1, %v287_v15, 0.0 }
 0x274   :  { %289 = vadd.xlane.f32.xlu0 %v288_v16 }
 0x301   :  { %v290_v23 = vpop.xlane.xlu0 %289 }
 0x302   :  { %v291_v24 = vmul.f32 0.03125, %v290_v23  ;;  %v865_v23 = vld [vmem:[%s1690_s17] ss:$0 sm:$0xff]  ;;  %s1266_s17 = scalar_lea.vmem %s826_s23, 128 }
 0x303   :  { %p1267_p12 = scmp.ne.s32.totalorder %s826_s23, %s1266_s17  ;;  %p1272_p0 = scmp.lt.s32.totalorder %s1266_s17, %s1266_s17 }
 0x304   :  { %v292_v25 = vadd.f32 1e-05, %v291_v24 }
 0x305   :  { %p1273_p1 = por %p1272_p0, %p1271_p13 }
 0x306   :  { %998 = vrsqrt.f32 %v292_v25 }
 0x307   :  { %p1274_p2 = pnand %p1273_p1, %p1267_p12 }
 0x310   :  { %v999_v26 = vpop.eup %998 }
 0x311   :  { %v294_v28 = vmul.f32 %v999_v26, %v286_v14  ;;  %v864_v14 = vld [vmem:[#allocation19] ss:$0 sm:$0xff] }
 0x313   :  { %v302_v30 = vmul.f32 %v844_v27, %v294_v28 }
 0x315   :  { %v310_v31 = vadd.f32 %v845_v29, %v302_v30  ;;  %v869_v30 = vld [vmem:[%s1692_s19] ss:$0 sm:$0xff] }
 0x317   :  { %1000 = vtanh.f32 %v310_v31 }
 0x321   :  { %v1001_v32 = vpop.eup %1000 }
 0x322   :  { %v312_v33 = vpack.c.bf16 %v1001_v32, %v1001_v32 }
 0x324   :  { %911 = vmatmul.mubr.msk.bf16.vlgmr.msra.gmra.mrb[0].mxu1 %vm237_vm1, %v312_v33 }
 0x325   :  { %924 = vmatprep.mubr.msk.bf16.mxu1 %vm1319_vm0, %v1318_v0  ;;  %921 = vmatpush3.bf16.msra.mxu1 %v987_v38 }
 0x326   :  { %922 = vmatprep.subr.bf16.mxu1 %v1318_v0 }
 0x329   :  { %923 = vmatpush3.bf16.msra.mxu1 %v988_v39 }
 0x32a   :  { %936 = vmatprep.subr.bf16.mxu1 %v1318_v0 }
 0x3f7   :  { %v367_v41 = vpop.f32.mrb[0].mxu1 }
 0x3f8   :  { %v416_v43 = vadd.f32 %v415_v34, %v367_v41  ;;  %v912_v44 = vpop.f32.mrb[1].mxu1 }
 0x3f9   :  { %v370_v45 = vpop.f32.mrb[2].mxu1 }
 0x3fa   :  { %v428_v46 = vadd.f32 %v850_v42, %v416_v43  ;;  %v913_v47 = vpop.f32.mrb[3].mxu1 }
 0x3fc   :  { %v429_v48 = vmax.f32 %v428_v46, 0.0 }
 0x3fe   :  { %v430_v50 = vpack.c.bf16 %v429_v48, %v429_v48 }
 0x400   :  { %925 = vmatmul.mubr.msk.bf16.vlgmr.msra.gmra.mrb[4].mxu1 %vm237_vm1, %v430_v50 }
 0x401   :  { %937 = vmatpush3.bf16.msra.mxu1 %v989_v49  ;;  %940 = vmatprep.mubr.msk.bf16.mxu1 %vm1319_vm0, %v1318_v0 }
 0x402   :  { %938 = vmatprep.subr.bf16.mxu1 %v1318_v0 }
 0x405   :  { %939 = vmatpush3.bf16.msra.mxu1 %v990_v51 }
 0x406   :  { %950 = vmatprep.subr.bf16.mxu1 %v1318_v0 }
 0x408   :  { %941 = vmatmul.mubr.msk.bf16.vlgmr.msra.gmra.mrb[8].mxu1 %vm237_vm1, %v312_v33 }
 0x409   :  { %954 = vmatprep.mubr.msk.bf16.mxu1 %vm1319_vm0, %v1318_v0  ;;  %951 = vmatpush3.bf16.msra.mxu1 %v994_v10 }
 0x40a   :  { %952 = vmatprep.subr.bf16.mxu1 %v1318_v0 }
 0x40d   :  { %953 = vmatpush3.bf16.msra.mxu1 %v995_v11 }
 0x4d3   :  { %v491_v54 = vpop.f32.mrb[4].mxu1 }
 0x4d4   :  { %v492_v55 = vadd.f32 %v851_v53, %v491_v54  ;;  %v926_v56 = vpop.f32.mrb[5].mxu1 }
 0x4d5   :  { %v494_v57 = vpop.f32.mrb[6].mxu1 }
 0x4d6   :  { %v497_v58 = vmax.f32 %v492_v55, 0.0  ;;  %v927_v59 = vpop.f32.mrb[7].mxu1 }
 0x4d8   :  { %v498_v61 = vpack.c.bf16 %v497_v58, %v497_v58 }
 0x4da   :  { %933 = vmatmul.mubr.msk.bf16.vlgmr.msra.gmra.mrb[8].mxu0 %vm237_vm1, %v498_v61 }
 0x4db   :  { %v618_v62 = vpop.f32.mrb[8].mxu1  ;;  %945 = vmatpush3.bf16.msra.mxu0 %v993_v60  ;;  %946 = vmatprep.mubr.msk.bf16.mxu0 %vm1319_vm0, %v1318_v0 }
 0x4dc   :  { %v942_v63 = vpop.f32.mrb[9].mxu1  ;;  %958 = vmatprep.subr.bf16.mxu0 %v1318_v0 }
 0x4dd   :  { %v621_v1 = vpop.f32.mrb[10].mxu1 }
 0x4de   :  { %v943_v2 = vpop.f32.mrb[11].mxu1 }
 0x5ad   :  { %v559_v4 = vpop.f32.mrb[8].mxu0 }
 0x5ae   :  { %v560_v5 = vadd.f32 %v855_v3, %v559_v4  ;;  %v934_v6 = vpop.f32.mrb[9].mxu0 }
 0x5af   :  { %v562_v7 = vpop.f32.mrb[10].mxu0 }
 0x5b0   :  { %v565_v8 = vpack.c.bf16 %v560_v5, %v560_v5  ;;  %v935_v9 = vpop.f32.mrb[11].mxu0 }
 0x5b2   :  { %947 = vmatmul.mubr.msk.bf16.vlgmr.msra.gmra.mrb[12].mxu0 %vm630_vm4, %v565_v8 }
 0x5b3   :  { %962 = vmatprep.mubr.msk.bf16.mxu0 %vm1319_vm0, %v1318_v0  ;;  %959 = vmatpush3.bf16.msra.mxu0 %v996_v12 }
 0x5b4   :  { %960 = vmatprep.subr.bf16.mxu0 %v1318_v0 }
 0x5b7   :  { %961 = vmatpush3.bf16.msra.mxu0 %v997_v22 }
 0x685   :  { %v668_v13 = vpop.f32.mrb[12].mxu0 }
 0x686   :  { %v669_v15 = vadd.f32 %v668_v13, %v618_v62  ;;  %v948_v16 = vpop.f32.mrb[13].mxu0 }
 0x687   :  { %v671_v17 = vpop.f32.mrb[14].mxu0 }
 0x688   :  { %v681_v18 = vadd.f32 %v864_v14, %v669_v15  ;;  %v949_v19 = vpop.f32.mrb[15].mxu0 }
 0x68a   :  { %v682_v20 = vmax.f32 %v681_v18, 0.0 }
 0x68c   :  { %v683_v21 = vpack.c.bf16 %v682_v20, %v682_v20 }
 0x68e   :  { %955 = vmatmul.mubr.msk.bf16.vlgmr.msra.gmra.mrb[12].mxu1 %vm237_vm1, %v683_v21 }
 0x761   :  { %v744_v24 = vpop.f32.mrb[12].mxu1 }
 0x762   :  { %v745_v25 = vadd.f32 %v865_v23, %v744_v24  ;;  %v956_v0 = vpop.f32.mrb[13].mxu1 }
 0x763   :  { %v747_v26 = vpop.f32.mrb[14].mxu1 }
 0x764   :  { %v750_v27 = vmax.f32 %v745_v25, 0.0  ;;  %v957_v28 = vpop.f32.mrb[15].mxu1 }
 0x766   :  { %v751_v29 = vpack.c.bf16 %v750_v27, %v750_v27 }
 0x768   :  { %963 = vmatmul.mubr.msk.bf16.vlgmr.msra.gmra.mrb[16].mxu0 %vm237_vm1, %v751_v29 }
 0x83b   :  { %v812_v31 = vpop.f32.mrb[16].mxu0 }
 0x83c   :  { %v813_v32 = vadd.f32 %v869_v30, %v812_v31  ;;  %v964_v33 = vpop.f32.mrb[17].mxu0 }
 0x83d   :  { %v815_v34 = vpop.f32.mrb[18].mxu0 }
 0x83e   :  { %818 = vst [vmem:[#allocation22] sm:$0xff] %v813_v32  ;;  %v965_v35 = vpop.f32.mrb[19].mxu0 }
 0x83f   :  { %1277 = shalt.err (!%p1274_p2)
}
 0x840   :  { %s1278_s19 = scalar_lea.hbm %s1693_s20, 128 }
 0x841   :  { %p1279_p3 = scmp.ne.s32.totalorder %s1693_s20, %s1278_s19  ;;  %p1282_p4 = scmp.lt.u32.totalorder %s1278_s19, %s1693_s20 }
 0x843   :  { %p1284_p5 = pnand %p1282_p4, %p1279_p3 }
 0x845   :  { %1287 = shalt.err (!%p1284_p5)
}
 0x846   :  { %828 = dma.vmem_to_hbm [thread:$0]  %s826_s23, 128, %s1693_s20, [#allocation4]  }
 0x847   :  { %1302 = dma.done.wait [#allocation4], 128  }
 0x848   :  { %1303 = vsyncadd [#allocation4], 4294967168 }
 0x849   :  { %832 = vsyncpa [#allocation3], 1 }
 0x84a   :  { %833 = vsyncpa [#allocation6], 1 }
 0x84b   :  { %834 = vsyncpa [#allocation9], 1 }
 0x84c   :  { %835 = vsyncpa [#allocation12], 1 }
 0x84d   :  { %836 = vsyncpa [#allocation15], 1 }
 0x84e   :  { %837 = vsyncpa [#allocation18], 1 }
 0x84f   :  { %838 = vsyncpa [#allocation21], 1 }
 0x850   :  { %839 = vsyncpa [#allocation4], 1 }

</bundles_post_ra>
